<compile_context>
chip_gen: v6e
topology: v6e:2x2x1
jax: 0.10.0
libtpu: 0.0.40
codegen_flags: <defaults>
</compile_context>

<pallas_src>
import jax
import jax.numpy as jnp
from jax.experimental import pallas as pl
from jax.experimental.pallas import tpu as pltpu

LANE = 128


def _cdiv(a, b):
    return (a + b - 1) // b


def _vmem_capacity_bytes():
    try:
        return int(pltpu.get_tpu_info().vmem_capacity_bytes)
    except Exception:
        return 64 << 20  # conservative default (v7x per-TC VMEM)


def _clamp_vmem_limit(need, capacity):
    return int(min(max(need, 16 << 20), max(32 << 20, int(capacity * 0.9))))


# ----------------------------- kernels --------------------------------------

def _make_fused_kernel(inv_hw, inv_hwm1):
    """Whole (C, HW) batch slab resident: stats + conv + gate + scale."""
    def kernel(mix_ref, w_ref, x_ref, o_ref):
        x = x_ref[0].astype(jnp.float32)                         # (C, HW)
        mean = jnp.sum(x, axis=1, keepdims=True) * inv_hw        # (C, 1)
        d = x - mean
        var = jnp.sum(d * d, axis=1, keepdims=True) * inv_hwm1   # unbiased (NaN @ HW==1, like torch)
        pooled = mix_ref[0] * mean + mix_ref[1] * jnp.sqrt(var)  # (C, 1)
        conv = jnp.dot(w_ref[...], pooled,
                       preferred_element_type=jnp.float32)       # (C, 1) band matvec
        gate = jax.nn.sigmoid(conv)
        o_ref[0] = (x * gate).astype(o_ref.dtype)
    return kernel


def _make_stats_kernel(C, HW, HW_TILE, inv_hw, inv_hwm1, ragged):
    """Tiled pass 1: lane-wise moment accumulation -> gate (C, 1) in epilogue."""
    chunks = HW_TILE // LANE

    def kernel(mix_ref, w_ref, x_ref, gate_ref, s1_ref, s2_ref):
        t = pl.program_id(1)

        @pl.when(t == 0)
        def _():
            s1_ref[...] = jnp.zeros_like(s1_ref)
            s2_ref[...] = jnp.zeros_like(s2_ref)

        base = t * HW_TILE
        if ragged:  # hoisted iota; ragged last tile masked against true HW
            lane = jax.lax.broadcasted_iota(jnp.int32, (C, LANE), 1)

        s1 = s1_ref[...]
        s2 = s2_ref[...]
        for c in range(chunks):                       # static 128-lane chunks, VALU only
            xc = x_ref[0, :, pl.ds(c * LANE, LANE)].astype(jnp.float32)
            if ragged:
                xc = jnp.where(base + c * LANE + lane < HW, xc, 0.0)
            s1 = s1 + xc
            s2 = s2 + xc * xc
        s1_ref[...] = s1
        s2_ref[...] = s2

        @pl.when(t == pl.num_programs(1) - 1)
        def _():
            ssum = jnp.sum(s1_ref[...], axis=1, keepdims=True)   # single XLU reduce
            ssq = jnp.sum(s2_ref[...], axis=1, keepdims=True)
            mean = ssum * inv_hw
            # TODO(synk): mean-shift / Kahan-compensate the one-pass moments if
            # |mean| >> std at very large HW ever exceeds tolerance.
            var = jnp.maximum(ssq - ssum * mean, 0.0) * inv_hwm1
            pooled = mix_ref[0] * mean + mix_ref[1] * jnp.sqrt(var)
            conv = jnp.dot(w_ref[...], pooled,
                           preferred_element_type=jnp.float32)
            gate_ref[0] = jax.nn.sigmoid(conv)                   # (C, 1)
    return kernel


def _scale_kernel(x_ref, gate_ref, o_ref):
    """Tiled pass 2: out = x * gate, emitted directly in the final dtype."""
    o_ref[0] = (x_ref[0].astype(jnp.float32) * gate_ref[0]).astype(o_ref.dtype)


# ----------------------------- wrapper ---------------------------------------

def mca_gate(x, conv_w, pool_weight, *, force_two_pass=False,
             hw_tile_budget_bytes=None):
    """MCAGate forward.

    x: (B, C, H, W); conv_w: (k,) taps of Conv2d(1, 1, (1, k), bias=False);
    pool_weight: (2,) raw (pre-sigmoid) pooling mix weights.
    """
    B, C, H, W = x.shape
    HW = H * W
    k = int(conv_w.shape[0])
    pad = (k - 1) // 2
    itemsize = jnp.dtype(x.dtype).itemsize

    x_flat = x.reshape(B, C, HW)  # native dtype; no pad / no upcast

    # Tiny host-side parameter prep (scalars + (C, C) band matrix).
    mix = (0.5 + jax.nn.sigmoid(pool_weight)).astype(jnp.float32)   # (2,)
    cw = conv_w.astype(jnp.float32)
    rows = jnp.arange(C)[:, None]
    cols = jnp.arange(C)[None, :]
    wmat = jnp.zeros((C, C), jnp.float32)
    for tap in range(k):                                            # W[i, i+tap-pad] = cw[tap]
        wmat = wmat + jnp.where(cols == rows + (tap - pad), cw[tap], 0.0)

    inv_hw = 1.0 / HW
    inv_hwm1 = 1.0 / (HW - 1) if HW > 1 else float("inf")           # NaN std @ HW==1 (torch parity)

    capacity = _vmem_capacity_bytes()

    # ----------------- fused path: one kernel, grid over B ------------------
    fused_need = (4 * C * HW * itemsize          # double-buffered in + out blocks
                  + 12 * C * HW                  # in-kernel f32 working copies
                  + 4 * C * C + (4 << 20))
    if not force_two_pass and fused_need <= int(capacity * 0.7):
        out = pl.pallas_call(
            _make_fused_kernel(inv_hw, inv_hwm1),
            out_shape=jax.ShapeDtypeStruct((B, C, HW), x.dtype),
            grid=(B,),
            in_specs=[
                pl.BlockSpec(memory_space=pltpu.MemorySpace.SMEM),     # mix (2,)
                pl.BlockSpec((C, C), lambda b: (0, 0)),                # band matrix
                pl.BlockSpec((1, C, HW), lambda b: (b, 0, 0)),         # x slab
            ],
            out_specs=pl.BlockSpec((1, C, HW), lambda b: (b, 0, 0)),
            compiler_params=pltpu.CompilerParams(
                dimension_semantics=("parallel",),
                vmem_limit_bytes=_clamp_vmem_limit(fused_need, capacity)),
        )(mix, wmat, x_flat)
        return out.reshape(B, C, H, W)

    # ----------------- tiled two-pass path -----------------------------------
    if hw_tile_budget_bytes is None:
        hw_tile_budget_bytes = (16 << 20) if capacity >= (100 << 20) else (8 << 20)
    chunk_bytes = C * LANE * (itemsize + 4)       # native DMA + f32 working set
    chunks = max(1, min(_cdiv(HW, LANE), hw_tile_budget_bytes // chunk_bytes))
    HW_TILE = chunks * LANE
    n_tiles = _cdiv(HW, HW_TILE)                  # cdiv grid; ragged last tile masked
    ragged = (HW % HW_TILE) != 0

    xb = C * HW_TILE * itemsize
    p1_need = 2 * xb + 8 * C * HW_TILE + 2 * C * LANE * 4 + 4 * C * C + (4 << 20)
    p2_need = 4 * xb + 4 * C * HW_TILE + (4 << 20)

    # Pass 1: fused moments -> weighted pool -> 1xk channel conv -> gate (B, C, 1).
    # TODO(synk): for B < 2 on v7x, split the HW reduction into 2 groups so both
    # TensorCores participate, combining partials in the pass-2 prologue.
    gate = pl.pallas_call(
        _make_stats_kernel(C, HW, HW_TILE, inv_hw, inv_hwm1, ragged),
        out_shape=jax.ShapeDtypeStruct((B, C, 1), jnp.float32),
        grid=(B, n_tiles),
        in_specs=[
            pl.BlockSpec(memory_space=pltpu.MemorySpace.SMEM),         # mix (2,)
            pl.BlockSpec((C, C), lambda b, t: (0, 0)),                 # band matrix
            pl.BlockSpec((1, C, HW_TILE), lambda b, t: (b, 0, t)),     # x tile
        ],
        out_specs=pl.BlockSpec((1, C, 1), lambda b, t: (b, 0, 0)),
        scratch_shapes=[pltpu.VMEM((C, LANE), jnp.float32),            # lane-wise sum(x)
                        pltpu.VMEM((C, LANE), jnp.float32)],           # lane-wise sum(x*x)
        compiler_params=pltpu.CompilerParams(
            dimension_semantics=("parallel", "arbitrary"),
            vmem_limit_bytes=_clamp_vmem_limit(p1_need, capacity)),
    )(mix, wmat, x_flat)

    # Pass 2: out = x * gate, lane-dense tiles, final dtype emitted in-kernel.
    # TODO(synk): when the caller donates x, add input_output_aliases={0: 0}
    # here to drop one full-size HBM allocation.
    out = pl.pallas_call(
        _scale_kernel,
        out_shape=jax.ShapeDtypeStruct((B, C, HW), x.dtype),
        grid=(B, n_tiles),
        in_specs=[
            pl.BlockSpec((1, C, HW_TILE), lambda b, t: (b, 0, t)),     # x tile
            pl.BlockSpec((1, C, 1), lambda b, t: (b, 0, 0)),           # gate
        ],
        out_specs=pl.BlockSpec((1, C, HW_TILE), lambda b, t: (b, 0, t)),
        compiler_params=pltpu.CompilerParams(
            dimension_semantics=("parallel", "parallel"),
            vmem_limit_bytes=_clamp_vmem_limit(p2_need, capacity)),
    )(x_flat, gate)

    return out.reshape(B, C, H, W)


# ----------------------------- reference -------------------------------------

def mca_gate_ref(x, conv_w, pool_weight):
    """Pure-JAX reference reproducing the PyTorch MCAGate forward."""
    B, C, H, W = x.shape
    xf = x.reshape(B, C, -1).astype(jnp.float32)
    mean = xf.mean(axis=2)                                          # (B, C)
    std = jnp.sqrt(((xf - mean[..., None]) ** 2).sum(axis=2) / (H * W - 1))
    w = jax.nn.sigmoid(pool_weight)
    out = 0.5 * (mean + std) + w[0] * mean + w[1] * std             # (B, C)
    k = conv_w.shape[0]
    pad = (k - 1) // 2
    out_p = jnp.pad(out, ((0, 0), (pad, pad)))
    conv = jnp.stack([jnp.sum(out_p[:, i:i + k] * conv_w, axis=1) for i in range(C)],
                     axis=1)                                        # (B, C)
    gate = jax.nn.sigmoid(conv)
    return (x.astype(jnp.float32) * gate[:, :, None, None]).astype(x.dtype)


if __name__ == "__main__":
    key = jax.random.PRNGKey(0)
    kx, kc, kw = jax.random.split(key, 3)

    B, C, H, W = 2, 4, 16, 16
    k_size = 3

    x = jax.random.normal(kx, (B, C, H, W), dtype=jnp.float32)
    # Conv2d(1, 1, (1, k), bias=False) weight -> deterministic uniform (fan_in = k)
    conv_w = jax.random.uniform(kc, (k_size,), jnp.float32, -1.0, 1.0) / jnp.sqrt(k_size)
    # nn.Parameter(torch.rand(2)) -> deterministic uniform [0, 1)
    pool_weight = jax.random.uniform(kw, (2,), jnp.float32)

    y_ref = mca_gate_ref(x, conv_w, pool_weight)

    # Default path (fused single kernel at this size).
    y = jax.block_until_ready(mca_gate(x, conv_w, pool_weight))
    assert y.shape == x.shape and y.dtype == x.dtype
    err = float(jnp.max(jnp.abs(y - y_ref)))
    assert jnp.allclose(y, y_ref, atol=1e-4, rtol=1e-4), err

    # Tiled two-pass path (forced, tiny tile budget -> 2 HW tiles, exercises
    # the cross-tile moment accumulator + gate/scale kernels).
    y2 = jax.block_until_ready(
        mca_gate(x, conv_w, pool_weight, force_two_pass=True, hw_tile_budget_bytes=1))
    err2 = float(jnp.max(jnp.abs(y2 - y_ref)))
    assert jnp.allclose(y2, y_ref, atol=1e-4, rtol=1e-4), err2

    print("KERNEL_OK")
</pallas_src>

<mosaic_0001>
module attributes {stable_mosaic.version = 11 : i64} {
  func.func @kernel(%arg0: i32, %arg1: memref<2xf32, #tpu.memory_space<smem>>, %arg2: memref<4x4xf32, #tpu.memory_space<vmem>>, %arg3: memref<1x4x256xf32, #tpu.memory_space<vmem>>, %arg4: memref<1x4x256xf32, #tpu.memory_space<vmem>>) attributes {dimension_semantics = [#tpu.dimension_semantics<parallel>], iteration_bounds = array<i64: 2>, scalar_prefetch = 0 : i64, scratch_operands = 0 : i64, tpu.core_type = #tpu.core_type<tc>, window_params = [{transform_indices = @transform_0, window_bounds = array<i64: 2>}, {pipeline_mode = #tpu.pipeline_mode<synchronous>, transform_indices = @transform_1, window_bounds = array<i64: 4, 4>}, {transform_indices = @transform_2, window_bounds = array<i64: 1, 4, 256>}, {transform_indices = @transform_3, window_bounds = array<i64: 1, 4, 256>}]} {
    %c0 = arith.constant 0 : index
    %c0_0 = arith.constant 0 : index
    %c0_1 = arith.constant 0 : index
    %0 = vector.load %arg3[%c0, %c0_0, %c0_1] : memref<1x4x256xf32, #tpu.memory_space<vmem>>, vector<1x4x256xf32>
    %1 = vector.shape_cast %0 : vector<1x4x256xf32> to vector<4x256xf32>
    %cst = arith.constant dense<0.000000e+00> : vector<4xf32>
    %2 = vector.multi_reduction <add>, %1, %cst [1] : vector<4x256xf32> to vector<4xf32>
    %3 = vector.shape_cast %2 : vector<4xf32> to vector<4x1xf32>
    %cst_2 = arith.constant 3.906250e-03 : f32
    %4 = vector.broadcast %cst_2 : f32 to vector<4x1xf32>
    %5 = arith.mulf %3, %4 : vector<4x1xf32>
    %6 = vector.broadcast %5 : vector<4x1xf32> to vector<4x256xf32>
    %7 = arith.subf %1, %6 : vector<4x256xf32>
    %8 = arith.mulf %7, %7 : vector<4x256xf32>
    %cst_3 = arith.constant dense<0.000000e+00> : vector<4xf32>
    %9 = vector.multi_reduction <add>, %8, %cst_3 [1] : vector<4x256xf32> to vector<4xf32>
    %10 = vector.shape_cast %9 : vector<4xf32> to vector<4x1xf32>
    %cst_4 = arith.constant 0.00392156886 : f32
    %11 = vector.broadcast %cst_4 : f32 to vector<4x1xf32>
    %12 = arith.mulf %10, %11 : vector<4x1xf32>
    %c0_5 = arith.constant 0 : index
    %13 = memref.load %arg1[%c0_5] : memref<2xf32, #tpu.memory_space<smem>>
    %14 = vector.broadcast %13 : f32 to vector<4x1xf32>
    %15 = arith.mulf %14, %5 : vector<4x1xf32>
    %c1 = arith.constant 1 : index
    %16 = memref.load %arg1[%c1] : memref<2xf32, #tpu.memory_space<smem>>
    %17 = math.sqrt %12 : vector<4x1xf32>
    %18 = vector.broadcast %16 : f32 to vector<4x1xf32>
    %19 = arith.mulf %18, %17 : vector<4x1xf32>
    %20 = arith.addf %15, %19 : vector<4x1xf32>
    %c0_6 = arith.constant 0 : index
    %c0_7 = arith.constant 0 : index
    %21 = vector.load %arg2[%c0_6, %c0_7] : memref<4x4xf32, #tpu.memory_space<vmem>>, vector<4x4xf32>
    %cst_8 = arith.constant dense<0.000000e+00> : vector<4x1xf32>
    %22 = tpu.matmul %21, %20, %cst_8 {dimension_numbers = #tpu.dot_dimension_numbers<[1], [0], [0], [1], [0, 0, 1, 1], [], []>} : vector<4x4xf32>, vector<4x1xf32>, vector<4x1xf32> -> vector<4x1xf32>
    %23 = arith.negf %22 : vector<4x1xf32>
    %24 = math.exp %23 : vector<4x1xf32>
    %cst_9 = arith.constant 1.000000e+00 : f32
    %25 = vector.broadcast %cst_9 : f32 to vector<4x1xf32>
    %26 = arith.addf %25, %24 : vector<4x1xf32>
    %27 = arith.divf %25, %26 : vector<4x1xf32>
    %28 = vector.broadcast %27 : vector<4x1xf32> to vector<4x256xf32>
    %29 = arith.mulf %1, %28 : vector<4x256xf32>
    %c0_10 = arith.constant 0 : index
    %c0_11 = arith.constant 0 : index
    %c0_12 = arith.constant 0 : index
    %30 = vector.load %arg4[%c0_10, %c0_11, %c0_12] : memref<1x4x256xf32, #tpu.memory_space<vmem>>, vector<1x4x256xf32>
    %31 = vector.shape_cast %30 : vector<1x4x256xf32> to vector<4x256xf32>
    %32 = vector.shape_cast %29 : vector<4x256xf32> to vector<1x4x256xf32>
    tpu.vector_store %arg4[%c0_10, %c0_11, %c0_12], %32 {strides = array<i32>} : memref<1x4x256xf32, #tpu.memory_space<vmem>>, vector<1x4x256xf32>,
    return
  }
  func.func @transform_0(%arg0: i32) -> i32 {
    %c0_i32 = arith.constant 0 : i32
    %c0_i32_0 = arith.constant 0 : i32
    return %c0_i32 : i32
  }
  func.func @transform_1(%arg0: i32) -> (i32, i32) {
    %c0_i32 = arith.constant 0 : i32
    %c0_i32_0 = arith.constant 0 : i32
    %c0_i32_1 = arith.constant 0 : i32
    return %c0_i32, %c0_i32_0 : i32, i32
  }
  func.func @transform_2(%arg0: i32) -> (i32, i32, i32) {
    %c0_i32 = arith.constant 0 : i32
    %c0_i32_0 = arith.constant 0 : i32
    %c0_i32_1 = arith.constant 0 : i32
    return %arg0, %c0_i32, %c0_i32_0 : i32, i32, i32
  }
  func.func @transform_3(%arg0: i32) -> (i32, i32, i32) {
    %c0_i32 = arith.constant 0 : i32
    %c0_i32_0 = arith.constant 0 : i32
    %c0_i32_1 = arith.constant 0 : i32
    return %arg0, %c0_i32, %c0_i32_0 : i32, i32, i32
  }
}

</mosaic_0001>

<bundles_post_ra>
// kernel: tpu_custom_call.1
= control target key start
LH: loop header
LB: loop body
LE: loop exit
PB: predicated region body
PF: predicated region fallthrough
CT: control target
= control target key end

     0   :  { %8 = vsyncpa [#allocation5], 0  ;;  %s927_s0 = inlined_call_operand.hbm [shape: f32[2], index: 0, kind: input, shape index: {}]   ;;  %s928_s1 = inlined_call_operand.hbm [shape: f32[4,4], index: 1, kind: input, shape index: {}]   ;;  %s929_s2 = inlined_call_operand.hbm [shape: f32[2,4,256], index: 2, kind: input, shape index: {}]   ;;  %s930_s3 = inlined_call_operand.hbm [shape: f32[2,4,256], index: 3, kind: output, shape index: {}]  }
   0x1   :  { %9 = vsyncpa [#allocation3], 0 }
   0x2   :  { %10 = vsyncpa [#allocation8], 0 }
   0x3   :  { %12 = vsyncpa [#allocation8 + $0x1], 0 }
   0x4   :  { %13 = vsyncpa [#allocation4], 0 }
   0x5   :  { %15 = vsyncpa [#allocation4 + $0x1], 0  ;;  %s742_s12 = smov 0   ;;  %s744_s13 = smov 0  }
   0x6   :  { %s746_s14 = smov 0   ;;  %s748_s15 = smov 0  }
   0x7 LB: > { %s763_s16 = sadd.s32 4294967295, %s712_s15   ;;  %s464_s17 = sadd.s32 4294967294, %s712_s15   ;;  %s712_s15 = sphi %s748_s15, %s954_s15   ;;  %s708_s14 = sphi %s746_s14, %s953_s14   ;;  %s704_s13 = sphi %s744_s13, %s952_s13   ;;  %s700_s12 = sphi %s742_s12, %s951_s12  }
   0x8   : > { %p83_p0 = scmp.ne.s32.totalorder %s704_s13, %s700_s12  ;;  %p931_p1 = scmp.eq.s32.totalorder %s763_s16, 0 }
   0x9   : > { %p107_p2 = scmp.eq.s32.totalorder %s763_s16, 1  ;;  %p113_p3 = scmp.eq.s32.totalorder %s464_s17, 1 }
   0xa   : > { %p772_p4 = por %p931_p1, %p83_p0  ;;  %p465_p5 = scmp.ge.s32.totalorder %s712_s15, 1 }
   0xb   : > { %p777_p6 = por %p113_p3, %p83_p0  ;;  %p120_p7 = scmp.lt.s32.totalorder %s712_s15, 3 }
   0xc   : > { %s935_s18 = scalar_select %p772_p4, 1, 0 }
   0xd   : > { %s936_s19 = scalar_select %p777_p6, 1, 0 }
   0xe   : > { %p782_p8 = pnand %p465_p5, %p120_p7  ;;  %s714_s21 = smov [#allocation6]  }
   0xf   : > { %s142_s22 = sshll.u32 %s714_s21, 4  ;;  %s796_s24 = sadd.s32 1, %s712_s15   ;;  %s143_s22 = int_to_ptr.vmem [resolvable:$true] %s142_s22 }
  0x10   : > { %s937_s20 = scalar_select %p782_p8, 1, 0 }
  0x11   : > { %p507_p10 = pneg %p782_p8  ;;  %s67_s25 = ssub.s32 %s712_s15, %s796_s24 }
  0x12   : > { %s70_s26 = sadd.s32 1, %s708_s14  ;;  %p801_p12 = scmp.eq.s32.totalorder %s67_s25, 0 }
  0x13   : > { %p791_p11 = pnand %p507_p10, %p931_p1  ;;  %s715_s28 = smov [#allocation2]  }
  0x14   : > { %s597_s4 = scalar_lea.vmem %s143_s22, 64  ;;  %p605_p7 = scmp.lt.s32.totalorder %s143_s22, %s143_s22 }
  0x15   : > { %510 = dma.hbm_to_smem (!%p791_p11), %s927_s0, 16, %s715_s28, [#allocation5]  }
  0x16   : > { %p588_p13 = pneg %p791_p11  ;;  %p598_p0 = scmp.ne.s32.totalorder %s143_s22, %s597_s4 }
  0x17   : > { %p606_p10 = scmp.lt.s32.totalorder %s597_s4, %s597_s4 }
  0x18   : > { %p600_p3 = pnand %p598_p0, %p588_p13 }
  0x19   : > { %p607_p9 = por %p606_p10, %p605_p7 }
  0x1a   : > { %p601_p5 = pneg %p600_p3 }
  0x1c   : > { %p608_p1 = pnand %p607_p9, %p601_p5 }
  0x1e   : > { %611 = shalt.err (!%p608_p1)
}
  0x1f   : > { %513 = dma.hbm_to_vmem [thread:$0]  (!%p791_p11), %s928_s1, 64, %s143_s22, [#allocation3]  }
  0x20   : > { %s820_s7 = scalar_select %p801_p12, %s708_s14, %s70_s26  }
  0x21   : > { %p77_p9 = scmp.ne.s32.totalorder %s708_s14, %s704_s13  ;;  %p78_p1 = scmp.eq.s32.totalorder %s712_s15, 0 }
  0x22   : > { %p524_p13 = scmp.lt.s32.totalorder %s712_s15, 2  ;;  %s153_s8 = sand.u32 1, %s708_s14  }
  0x23   : > { %p79_p0 = por %p78_p1, %p77_p9  ;;  %p829_p3 = por %p107_p2, %p77_p9 }
  0x24   : > { %s469_s10 = sshll.u32 %s153_s8, 3  ;;  %s486_s11 = sshll.u32 %s712_s15, 7 }
  0x25   : > { %s940_s9 = scalar_select %p829_p3, 1, 0 }
  0x26   : > { %s837_s23 = scalar_lea.hbm %s929_s2, %s486_s11  ;;  %s157_s22 = scalar_lea.vmem [#allocation7], %s469_s10 }
  0x27   : > { %s165_s25 = sshll.u32 %s157_s22, 4  ;;  %p839_p11 = pnand %p524_p13, %p79_p0  ;;  %s166_s25 = int_to_ptr.vmem [resolvable:$true] %s165_s25 }
  0x28   : > { %s154_s27 = scalar_lea.sflag [#allocation8], %s153_s8  ;;  %s612_s28 = scalar_lea.hbm %s837_s23, 128 }
  0x29   : > { %p613_p2 = scmp.ne.s32.totalorder %s837_s23, %s612_s28  ;;  %p614_p12 = pneg %p839_p11 }
  0x2a   : > { %s617_s4 = scalar_lea.hbm %s929_s2, 256  ;;  %p618_p10 = scmp.lt.s32.totalorder %s837_s23, %s929_s2 }
  0x2b   : > { %p615_p5 = pnand %p614_p12, %p613_p2  ;;  %p619_p9 = scmp.lt.s32.totalorder %s617_s4, %s612_s28 }
  0x2d   : > { %p616_p7 = pneg %p615_p5  ;;  %p620_p1 = por %p619_p9, %p618_p10 }
  0x2f   : > { %p621_p13 = pnand %p620_p1, %p616_p7 }
  0x31   : > { %624 = shalt.err (!%p621_p13)
}
  0x32   : > { %s625_s10 = scalar_lea.vmem %s166_s25, 128  ;;  %s716_s8 = smov [#allocation7]  }
  0x33   : > { %p626_p0 = scmp.ne.s32.totalorder %s166_s25, %s625_s10  ;;  %s630_s11 = sshll.u32 %s716_s8, 4  ;;  %s631_s11 = int_to_ptr.vmem [resolvable:$false] %s630_s11 }
  0x34   : > { %s632_s17 = scalar_lea.vmem %s631_s11, 256  ;;  %p633_p2 = scmp.lt.s32.totalorder %s166_s25, %s631_s11 }
  0x35   : > { %p628_p6 = pnand %p626_p0, %p614_p12  ;;  %p634_p5 = scmp.lt.s32.totalorder %s632_s17, %s625_s10 }
  0x37   : > { %p629_p3 = pneg %p628_p6  ;;  %p635_p4 = por %p634_p5, %p633_p2 }
  0x39   : > { %p636_p8 = pnand %p635_p4, %p629_p3 }
  0x3b   : > { %639 = shalt.err (!%p636_p8)
}
  0x3c   : > { %517 = dma.hbm_to_vmem [thread:$0]  (!%p839_p11), %s837_s23, 128, %s166_s25, %s154_s27  }
  0x3d   : > { %p942_p7 = scmp.ne.s32.totalorder %s937_s20, 0 }
  0x3e   : > { %p943_p10 = scmp.eq.s32.totalorder (!%p942_p7), %s763_s16, 0 }
  0x3f   : > { %174 = sbr.rel (%p942_p7) target bundleno = 765 (0x2fd), region = 32 }
  0x44   : > { %683 = dma.done.wait (%p943_p10), [#allocation5], 16   ;;  %p944_p6 = pmov %p943_p10 }
  0x46   : > { %685 = vsyncadd (%p944_p6), [#allocation5], 4294967280  ;;  %p945_p12 = pmov %p944_p6 }
  0x47   : > { %p946_p9 = pmov %p944_p6 }
  0x48   : > { %687 = dma.done.wait (%p945_p12), [#allocation3], 64  }
  0x49   : > { %689 = vsyncadd (%p946_p9), [#allocation3], 4294967232  ;;  %s868_s21 = sand.u32 1, %s704_s13   ;;  %p947_p4 = scmp.ne.s32.totalorder %s935_s18, 0 }
  0x4a   : > { %s475_s20 = sshll.u32 %s868_s21, 3  ;;  %s185_s23 = scalar_lea.sflag [#allocation8], %s868_s21 }
  0x4b   : > { %s188_s22 = scalar_lea.vmem [#allocation7], %s475_s20 }
  0x4c   : > { %691 = dma.done.wait (%p947_p4), %s185_s23, 128  }
  0x4d   : > { %693 = vsyncadd (%p947_p4), %s185_s23, 4294967168 }
  0x4e   : > { %193 = sfence }
  0x4f   : > { %v878_v0 = vld [vmem:[%s188_s22] sm:$0xff]  ;;  %vm216_vm0 = vcmask 1043456   ;;  %v717_v5 = vmov 839922192   ;;  %v227_v7 = vlaneseq  ;;  %v718_v20 = vmov 0.0   ;;  %s243_s18 = sld [smem:[#allocation2]] }
  0x50   : > { %v214_v1 = vcombine.high %v878_v0, %v878_v0  ;;  %v217_v2 = vsel %vm216_vm0, %v878_v0, 0.0  ;;  %v225_v6 = vunpack.c.l.s4 %v717_v5  ;;  %490 = vmatprep.subr.mxu0 %v718_v20  ;;  %vm719_vm1 = vmmov 0   ;;  %s477_s25 = sld [smem:[#allocation2 + $0x1]]  ;;  %v257_v33 = vld [vmem:[#allocation6] sm:$0xf]  ;;  %s487_s26 = sshll.u32 %s763_s16, 7 }
  0x51   : > { %v228_v9 = vshrl.u32 %v227_v7, 7  ;;  %492 = vmatprep.mubr.msk.f32.mxu0 %vm719_vm1, %v718_v20  ;;  %vm258_vm4 = vcmask 31744   ;;  %v720_v34 = vmov 0   ;;  %s211_s27 = scalar_lea.vmem [#allocation9], %s475_s20  ;;  %s368_s4 = scalar_lea.hbm %s930_s3, %s487_s26 }
  0x52   : > { %v218_v3 = vsel %vm216_vm0, %v214_v1, 0.0  ;;  %v226_v8 = vunpack.c.0.s8 %v225_v6  ;;  %566 = vset.pattern.permute.xlu1 %v720_v34  ;;  %567 = vset.pattern.permute.xlu0 %v720_v34  ;;  %s370_s28 = sshll.u32 %s211_s27, 4  ;;  %s356_s5 = scalar_lea.sflag [#allocation4], %s868_s21  ;;  %s371_s28 = int_to_ptr.vmem [resolvable:$true] %s370_s28 }
  0x53   : > { %v219_v4 = vadd.f32 %v218_v3, %v217_v2  ;;  %s640_s6 = scalar_lea.vmem %s371_s28, 128  ;;  %p948_p3 = scmp.ne.s32.totalorder %s940_s9, 0 }
  0x54   : > { %v229_v10 = vsub.s32 %v226_v8, %v228_v9  ;;  %p641_p8 = scmp.ne.s32.totalorder %s371_s28, %s640_s6  ;;  %s721_s10 = smov [#allocation9]  }
  0x55   : > { %220 = vadd.xlane.f32.xlu0 %v219_v4  ;;  %v244_v25 = vstv %s243_s18  ;;  %s644_s16 = sshll.u32 %s721_s10, 4  ;;  %s645_s16 = int_to_ptr.vmem [resolvable:$false] %s644_s16 }
  0x56   : > { %v254_v27 = vstv %s477_s25  ;;  %p642_p11 = pnand %p641_p8, %p948_p3  ;;  %s646_s8 = scalar_lea.vmem %s645_s16, 256 }
  0x57   : > { %p647_p13 = scmp.lt.s32.totalorder %s371_s28, %s645_s16  ;;  %p648_p0 = scmp.lt.s32.totalorder %s646_s8, %s640_s6 }
  0x58   : > { %p643_p1 = pneg %p642_p11 }
  0x59   : > { %p649_p2 = por %p648_p0, %p647_p13 }
  0x5b   : > { %p650_p5 = pnand %p649_p2, %p643_p1 }
  0xde   : > { %v221_v11 = vpop.xlane.xlu0 %220 }
  0xdf   : > { %v222_v12 = vmul.f32 0.00390625, %v221_v11 }
  0xe1   : > { %v230_v13 = vrot.slane %v222_v12, %v229_v10  ;;  %v245_v30 = vmul.f32 %v244_v25, %v222_v12 }
  0xe3   : > { %v232_v14 = vsub.f32 %v878_v0, %v230_v13 }
  0xe5   : > { %v233_v15 = vmul.f32 %v232_v14, %v232_v14 }
  0xe7   : > { %v235_v16 = vcombine.high %v233_v15, %v233_v15  ;;  %v237_v17 = vsel %vm216_vm0, %v233_v15, 0.0 }
  0xe9   : > { %v238_v18 = vsel %vm216_vm0, %v235_v16, 0.0 }
  0xea   : > { %v239_v19 = vadd.f32 %v238_v18, %v237_v17 }
  0xec   : > { %240 = vadd.xlane.f32.xlu0 %v239_v19 }
 0x175   : > { %v241_v21 = vpop.xlane.xlu0 %240 }
 0x176   : > { %v242_v22 = vmul.f32 0.003921569, %v241_v21 }
 0x178   : > { %569 = vrsqrt.f32 %v242_v22  ;;  %vm249_vm2 = vcmp.eq.f32.partialorder %v242_v22, inf  ;;  %v252_v26 = vand.u32 2147483648, %v242_v22  ;;  %vm251_vm3 = vcmp.eq.f32.partialorder %v242_v22, 0.0 }
 0x185   : > { %v570_v23 = vpop.eup %569 }
 0x186   : > { %v248_v24 = vmul.f32 %v570_v23, %v242_v22 }
 0x188   : > { %v250_v28 = vsel %vm249_vm2, %v242_v22, %v248_v24 }
 0x189   : > { %v253_v29 = vsel %vm251_vm3, %v252_v26, %v250_v28 }
 0x18a   : > { %v255_v31 = vmul.f32 %v254_v27, %v253_v29 }
 0x18c   : > { %v256_v32 = vadd.f32 %v255_v31, %v245_v30 }
 0x18e   : > { %491 = vmatpush3.msk.msra.mxu0 %vm216_vm0, %v256_v32 }
 0x18f   : > { %493 = vmatmul.mubr.msk.f32.vlgmr.msra.gmra.mxu0 %vm258_vm4, %v257_v33 }
 0x24f   : > { %v331_v35 = vpop.f32.mrf.mxu0 }
 0x250   : > { %v480_v36 = vmul.f32 -1.442695, %v331_v35 }
 0x251   : > { %v494_v37 = vpop.f32.mrf.mxu0 }
 0x252   : > { %571 = vpow2.f32 %v480_v36 }
 0x25f   : > { %v572_v38 = vpop.eup %571 }
 0x260   : > { %v338_v39 = vadd.f32 1.0, %v572_v38 }
 0x262   : > { %573 = vrcp.f32 %v338_v39 }
 0x26f   : > { %v574_v40 = vpop.eup %573 }
 0x270   : > { %343 = vperm.xlu1 %566, %v574_v40  }
 0x2eb   : > { %v344_v41 = vpop.permute.xlu1 %343 }
 0x2ec   : > { %v351_v42 = vrot.slane %v344_v41, %v229_v10 }
 0x2ee   : > { %v353_v43 = vmul.f32 %v351_v42, %v878_v0 }
 0x2f0   : > { %354 = vst [vmem:[%s211_s27] sm:$0xff] %v353_v43 }
 0x2f1   : > { %653 = shalt.err (!%p650_p5)
}
 0x2f2   : > { %s654_s11 = scalar_lea.hbm %s368_s4, 128  ;;  %s658_s20 = scalar_lea.hbm %s930_s3, 256 }
 0x2f3   : > { %p655_p7 = scmp.ne.s32.totalorder %s368_s4, %s654_s11  ;;  %p659_p12 = scmp.lt.s32.totalorder %s368_s4, %s930_s3 }
 0x2f4   : > { %p660_p9 = scmp.lt.s32.totalorder %s658_s20, %s654_s11 }
 0x2f5   : > { %p656_p10 = pnand %p655_p7, %p948_p3 }
 0x2f6   : > { %p661_p4 = por %p660_p9, %p659_p12 }
 0x2f7   : > { %p657_p6 = pneg %p656_p10 }
 0x2f9   : > { %p662_p8 = pnand %p661_p4, %p657_p6 }
 0x2fb   : > { %665 = shalt.err (!%p662_p8)
}
 0x2fc   : > { %505 = dma.vmem_to_hbm [thread:$0]  (%p948_p3), %s371_s28, 128, %s368_s4, %s356_s5  }
 0x2fd PF: > { %s382_s18 = sand.u32 1, %s700_s12   ;;  %p949_p11 = scmp.ne.s32.totalorder %s936_s19, 0 }
 0x2fe   : > { %p950_p1 = scmp.ge.s32.totalorder %s712_s15, 2  ;;  %s383_s25 = scalar_lea.sflag [#allocation4], %s382_s18 }
 0x300   : > { %p519_p13 = pnand %p950_p1, %p949_p11 }
 0x302   : > { %p520_p0 = pneg %p519_p13 }
 0x304   : > { %695 = dma.done.wait (%p520_p0), %s383_s25, 128  }
 0x305   : > { %697 = vsyncadd (%p520_p0), %s383_s25, 4294967168  ;;  %p18_p2 = scmp.ge.s32.totalorder %s796_s24, 4   ;;  %s951_s12 = smov %s704_s13 }
 0x306   : > { %s952_s13 = smov %s708_s14  ;;  %s953_s14 = smov %s820_s7 }
 0x307   : > { %s954_s15 = smov %s796_s24  ;;  %20 = sbr.rel (!%p18_p2) target bundleno = 7 (0x7), region = 87 }
 0x30c   :  { %388 = vsyncpa [#allocation3], 1 }
 0x30d   :  { %390 = vsyncpa [#allocation3 + $0x1], 1 }
 0x30e   :  { %391 = vsyncpa [#allocation8], 1 }
 0x30f   :  { %393 = vsyncpa [#allocation8 + $0x1], 1 }
 0x310   :  { %394 = vsyncpa [#allocation4], 1 }
 0x311   :  { %396 = vsyncpa [#allocation4 + $0x1], 1 }
 0x312   :  { %397 = vsyncpa [#allocation5], 1 }
 0x313   :  { %399 = vsyncpa [#allocation5 + $0x1], 1 }

</bundles_post_ra>
